<compile_context>
chip_gen: v6e
topology: v6e:2x2x1
jax: 0.10.0
libtpu: 0.0.40
codegen_flags: <defaults>
</compile_context>

<pallas_src>
import jax
import jax.numpy as jnp
from jax.experimental import pallas as pl
from jax.experimental.pallas import tpu as pltpu

DIM = 32
NUM_HEADS = 4
FF_DIM = 4 * DIM
BATCH = 8            # acts as the attention sequence length S
N_INSTANCES = 8      # independent [BATCH, DIM] slabs for the batched demo
EPS = 1e-5           # PyTorch LayerNorm default eps


def transformer_block_kernel(x_ref, wqkv_ref, bqkv_ref, wo_ref, bo_ref,
                             w1_ref, b1_ref, w2_ref, b2_ref,
                             g1_ref, beta1_ref, g2_ref, beta2_ref,
                             o_ref, attn_sc):
    G, S, D = x_ref.shape                 # G instances per grid step
    H = NUM_HEADS
    hd = D // H
    scale = 1.0 / float(hd) ** 0.5

    # Row-flattened view (G*S, D): projections / FF / LayerNorm are row-wise.
    x2 = x_ref[...].astype(jnp.float32).reshape(G * S, D)

    # ---- fused qkv projection (weights pre-transposed: x @ W, no .T here) ----
    qkv = jnp.dot(x2, wqkv_ref[...], preferred_element_type=jnp.float32) + bqkv_ref[...]
    qkv3 = qkv.reshape(G, S, 3 * D)

    # ---- gather heads into one (H*G, S, hd) batch (lane slices + major stack) ----
    qh = jnp.stack([qkv3[:, :, h * hd:(h + 1) * hd] for h in range(H)], axis=0)
    kh = jnp.stack([qkv3[:, :, D + h * hd:D + (h + 1) * hd] for h in range(H)], axis=0)
    vh = jnp.stack([qkv3[:, :, 2 * D + h * hd:2 * D + (h + 1) * hd] for h in range(H)], axis=0)
    qh = qh.reshape(H * G, S, hd) * scale      # PyTorch scales q by 1/sqrt(hd)
    kh = kh.reshape(H * G, S, hd)
    vh = vh.reshape(H * G, S, hd)

    # ---- one batched QK^T, one softmax, one PV for all heads & instances ----
    s = jnp.einsum('bqd,bkd->bqk', qh, kh, preferred_element_type=jnp.float32)
    s = s - jnp.max(s, axis=-1, keepdims=True)
    p = jnp.exp(s)
    inv = pl.reciprocal(jnp.sum(p, axis=-1, keepdims=True), approx=True)   # EUP
    ctx = jnp.einsum('bqk,bkd->bqd', p, vh, preferred_element_type=jnp.float32) * inv

    # ---- place each head's output into its lane slice (scratch, no concat) ----
    ctx = ctx.reshape(H, G, S, hd)
    for h in range(H):
        attn_sc[:, :, h * hd:(h + 1) * hd] = ctx[h]
    attn = attn_sc[...].reshape(G * S, D)

    attn_out = jnp.dot(attn, wo_ref[...], preferred_element_type=jnp.float32) + bo_ref[...]

    # ---- residual + LayerNorm1 ----
    x2 = x2 + attn_out
    mu = jnp.mean(x2, axis=-1, keepdims=True)
    var = jnp.mean((x2 - mu) ** 2, axis=-1, keepdims=True)
    x2 = (x2 - mu) * jax.lax.rsqrt(var + EPS) * g1_ref[...] + beta1_ref[...]

    # ---- feed-forward: Linear -> ReLU -> Linear ----
    h1 = jnp.dot(x2, w1_ref[...], preferred_element_type=jnp.float32) + b1_ref[...]
    h1 = jnp.maximum(h1, 0.0)
    ff = jnp.dot(h1, w2_ref[...], preferred_element_type=jnp.float32) + b2_ref[...]

    # ---- residual + LayerNorm2 ----
    x2 = x2 + ff
    mu = jnp.mean(x2, axis=-1, keepdims=True)
    var = jnp.mean((x2 - mu) ** 2, axis=-1, keepdims=True)
    x2 = (x2 - mu) * jax.lax.rsqrt(var + EPS) * g2_ref[...] + beta2_ref[...]

    o_ref[...] = x2.reshape(G, S, D).astype(o_ref.dtype)


def transformer_block(x, params):
    """x: [batch, dim] (module path) or [n, batch, dim] (n independent instances)."""
    squeeze = (x.ndim == 2)
    if squeeze:
        x = x[None]                        # (1, S, D)
    N, S, D = x.shape

    # instances per grid step (amortizes per-step overhead; even grid for megacore)
    G = 4 if N % 4 == 0 else (2 if N % 2 == 0 else 1)
    grid = (N // G,)

    # Pre-transpose weights once outside the kernel (PyTorch stores [out, in]).
    wqkv_t = params["wqkv"].T              # (D, 3D)
    wo_t = params["wo"].T                  # (D, D)
    w1_t = params["w1"].T                  # (D, F)
    w2_t = params["w2"].T                  # (F, D)

    args = (x, wqkv_t, params["bqkv"], wo_t, params["bo"],
            w1_t, params["b1"], w2_t, params["b2"],
            params["g1"], params["beta1"], params["g2"], params["beta2"])

    def const_spec(a):
        nd = a.ndim
        # Same block index every grid step -> stays VMEM-resident (no re-DMA).
        return pl.BlockSpec(a.shape, lambda i, _nd=nd: (0,) * _nd)

    in_specs = ([pl.BlockSpec((G, S, D), lambda i: (i, 0, 0))]
                + [const_spec(a) for a in args[1:]])
    out_specs = pl.BlockSpec((G, S, D), lambda i: (i, 0, 0))

    out = pl.pallas_call(
        transformer_block_kernel,
        out_shape=jax.ShapeDtypeStruct((N, S, D), jnp.float32),
        grid=grid,
        in_specs=in_specs,
        out_specs=out_specs,
        scratch_shapes=[pltpu.VMEM((G, S, D), jnp.float32)],
        compiler_params=pltpu.CompilerParams(dimension_semantics=("parallel",)),
    )(*args)
    return out[0] if squeeze else out


def ref_forward(x, p):
    """Pure-JAX reference mirroring nn.MultiheadAttention + post-norm block."""
    S, D = x.shape
    H, hd = NUM_HEADS, D // NUM_HEADS
    qkv = x @ p["wqkv"].T + p["bqkv"]
    q, k, v = qkv[:, :D], qkv[:, D:2 * D], qkv[:, 2 * D:]
    q = q.reshape(S, H, hd).transpose(1, 0, 2) / jnp.sqrt(jnp.float32(hd))
    k = k.reshape(S, H, hd).transpose(1, 0, 2)
    v = v.reshape(S, H, hd).transpose(1, 0, 2)
    s = jnp.einsum("hqd,hkd->hqk", q, k)
    a = jax.nn.softmax(s, axis=-1)
    attn = jnp.einsum("hqk,hkd->hqd", a, v).transpose(1, 0, 2).reshape(S, D)
    attn_out = attn @ p["wo"].T + p["bo"]

    def ln(y, g, b):
        mu = y.mean(-1, keepdims=True)
        var = ((y - mu) ** 2).mean(-1, keepdims=True)
        return (y - mu) / jnp.sqrt(var + EPS) * g + b

    x = ln(x + attn_out, p["g1"], p["beta1"])
    h = jnp.maximum(x @ p["w1"].T + p["b1"], 0.0)
    x = ln(x + h @ p["w2"].T + p["b2"], p["g2"], p["beta2"])
    return x


if __name__ == "__main__":
    key = jax.random.PRNGKey(0)
    keys = jax.random.split(key, 10)

    def init(k, shape, scale=0.1):
        return jax.random.normal(k, shape, dtype=jnp.float32) * scale

    # Deterministic synthetic parameters (shapes follow the nn.Module __init__).
    params = {
        "wqkv": init(keys[0], (3 * DIM, DIM)),     # MHA in_proj_weight
        "bqkv": init(keys[1], (1, 3 * DIM)),       # MHA in_proj_bias
        "wo":   init(keys[2], (DIM, DIM)),         # MHA out_proj.weight
        "bo":   init(keys[3], (1, DIM)),           # MHA out_proj.bias
        "w1":   init(keys[4], (FF_DIM, DIM)),      # ff[0] Linear(dim, ff_dim)
        "b1":   init(keys[5], (1, FF_DIM)),
        "w2":   init(keys[6], (DIM, FF_DIM)),      # ff[2] Linear(ff_dim, dim)
        "b2":   init(keys[7], (1, DIM)),
        "g1":   jnp.ones((1, DIM), jnp.float32),   # norm1 (default init)
        "beta1": jnp.zeros((1, DIM), jnp.float32),
        "g2":   jnp.ones((1, DIM), jnp.float32),   # norm2
        "beta2": jnp.zeros((1, DIM), jnp.float32),
    }

    tb = jax.jit(transformer_block)
    # Tolerance is looser than f32 exact because the softmax denominator uses
    # the EUP approximate reciprocal (pl.reciprocal(..., approx=True)).
    TOL = 1e-2

    # 1) Module path: a single [batch, dim] input (matches the PyTorch forward).
    x = jax.random.normal(keys[8], (BATCH, DIM), dtype=jnp.float32)
    out = jax.block_until_ready(tb(x, params))
    ref = ref_forward(x, params)
    assert out.shape == (BATCH, DIM)
    err = jnp.max(jnp.abs(out - ref))
    assert err < TOL, f"single-instance mismatch vs reference: {err}"

    # 2) Batched path: many independent [batch, dim] instances in ONE pallas_call
    #    (grid over instance groups, resident weights, parallel grid axis).
    xb = jax.random.normal(keys[9], (N_INSTANCES, BATCH, DIM), dtype=jnp.float32)
    outb = jax.block_until_ready(tb(xb, params))
    refb = jax.vmap(lambda xi: ref_forward(xi, params))(xb)
    assert outb.shape == (N_INSTANCES, BATCH, DIM)
    errb = jnp.max(jnp.abs(outb - refb))
    assert errb < TOL, f"batched mismatch vs reference: {errb}"

    print("KERNEL_OK")
</pallas_src>

<mosaic_0001>
module attributes {stable_mosaic.version = 11 : i64} {
  func.func @transformer_block_kernel(%arg0: i32, %arg1: memref<1x8x32xf32, #tpu.memory_space<vmem>>, %arg2: memref<32x96xf32, #tpu.memory_space<vmem>>, %arg3: memref<1x96xf32, #tpu.memory_space<vmem>>, %arg4: memref<32x32xf32, #tpu.memory_space<vmem>>, %arg5: memref<1x32xf32, #tpu.memory_space<vmem>>, %arg6: memref<32x128xf32, #tpu.memory_space<vmem>>, %arg7: memref<1x128xf32, #tpu.memory_space<vmem>>, %arg8: memref<128x32xf32, #tpu.memory_space<vmem>>, %arg9: memref<1x32xf32, #tpu.memory_space<vmem>>, %arg10: memref<1x32xf32, #tpu.memory_space<vmem>>, %arg11: memref<1x32xf32, #tpu.memory_space<vmem>>, %arg12: memref<1x32xf32, #tpu.memory_space<vmem>>, %arg13: memref<1x32xf32, #tpu.memory_space<vmem>>, %arg14: memref<1x8x32xf32, #tpu.memory_space<vmem>>, %arg15: memref<1x8x32xf32, #tpu.memory_space<vmem>>) attributes {dimension_semantics = [#tpu.dimension_semantics<parallel>], iteration_bounds = array<i64: 1>, scalar_prefetch = 0 : i64, scratch_operands = 1 : i64, tpu.core_type = #tpu.core_type<tc>, window_params = [{transform_indices = @transform_0, window_bounds = array<i64: 1, 8, 32>}, {pipeline_mode = #tpu.pipeline_mode<synchronous>, transform_indices = @transform_1, window_bounds = array<i64: 32, 96>}, {pipeline_mode = #tpu.pipeline_mode<synchronous>, transform_indices = @transform_2, window_bounds = array<i64: 1, 96>}, {pipeline_mode = #tpu.pipeline_mode<synchronous>, transform_indices = @transform_3, window_bounds = array<i64: 32, 32>}, {pipeline_mode = #tpu.pipeline_mode<synchronous>, transform_indices = @transform_4, window_bounds = array<i64: 1, 32>}, {pipeline_mode = #tpu.pipeline_mode<synchronous>, transform_indices = @transform_5, window_bounds = array<i64: 32, 128>}, {pipeline_mode = #tpu.pipeline_mode<synchronous>, transform_indices = @transform_6, window_bounds = array<i64: 1, 128>}, {pipeline_mode = #tpu.pipeline_mode<synchronous>, transform_indices = @transform_7, window_bounds = array<i64: 128, 32>}, {pipeline_mode = #tpu.pipeline_mode<synchronous>, transform_indices = @transform_8, window_bounds = array<i64: 1, 32>}, {pipeline_mode = #tpu.pipeline_mode<synchronous>, transform_indices = @transform_9, window_bounds = array<i64: 1, 32>}, {pipeline_mode = #tpu.pipeline_mode<synchronous>, transform_indices = @transform_10, window_bounds = array<i64: 1, 32>}, {pipeline_mode = #tpu.pipeline_mode<synchronous>, transform_indices = @transform_11, window_bounds = array<i64: 1, 32>}, {pipeline_mode = #tpu.pipeline_mode<synchronous>, transform_indices = @transform_12, window_bounds = array<i64: 1, 32>}, {transform_indices = @transform_13, window_bounds = array<i64: 1, 8, 32>}]} {
    %c0 = arith.constant 0 : index
    %c0_0 = arith.constant 0 : index
    %c0_1 = arith.constant 0 : index
    %0 = vector.load %arg1[%c0, %c0_0, %c0_1] : memref<1x8x32xf32, #tpu.memory_space<vmem>>, vector<1x8x32xf32>
    %1 = vector.shape_cast %0 : vector<1x8x32xf32> to vector<8x32xf32>
    %c0_2 = arith.constant 0 : index
    %c0_3 = arith.constant 0 : index
    %2 = vector.load %arg2[%c0_2, %c0_3] : memref<32x96xf32, #tpu.memory_space<vmem>>, vector<32x96xf32>
    %cst = arith.constant dense<0.000000e+00> : vector<8x96xf32>
    %3 = tpu.matmul %1, %2, %cst {dimension_numbers = #tpu.dot_dimension_numbers<[1], [0], [0], [1], [0, 0, 1, 1], [], []>} : vector<8x32xf32>, vector<32x96xf32>, vector<8x96xf32> -> vector<8x96xf32>
    %c0_4 = arith.constant 0 : index
    %c0_5 = arith.constant 0 : index
    %4 = vector.load %arg3[%c0_4, %c0_5] : memref<1x96xf32, #tpu.memory_space<vmem>>, vector<1x96xf32>
    %5 = vector.broadcast %4 : vector<1x96xf32> to vector<8x96xf32>
    %6 = arith.addf %3, %5 : vector<8x96xf32>
    %7 = vector.shape_cast %6 : vector<8x96xf32> to vector<1x8x96xf32>
    %8 = vector.extract_strided_slice %7 {offsets = [0, 0, 0], sizes = [1, 8, 8], strides = [1, 1, 1]} : vector<1x8x96xf32> to vector<1x8x8xf32>
    %9 = vector.extract_strided_slice %7 {offsets = [0, 0, 8], sizes = [1, 8, 8], strides = [1, 1, 1]} : vector<1x8x96xf32> to vector<1x8x8xf32>
    %10 = vector.extract_strided_slice %7 {offsets = [0, 0, 16], sizes = [1, 8, 8], strides = [1, 1, 1]} : vector<1x8x96xf32> to vector<1x8x8xf32>
    %11 = vector.extract_strided_slice %7 {offsets = [0, 0, 24], sizes = [1, 8, 8], strides = [1, 1, 1]} : vector<1x8x96xf32> to vector<1x8x8xf32>
    %12 = vector.shape_cast %8 : vector<1x8x8xf32> to vector<1x1x8x8xf32>
    %13 = vector.shape_cast %9 : vector<1x8x8xf32> to vector<1x1x8x8xf32>
    %14 = vector.shape_cast %10 : vector<1x8x8xf32> to vector<1x1x8x8xf32>
    %15 = vector.shape_cast %11 : vector<1x8x8xf32> to vector<1x1x8x8xf32>
    %16 = tpu.concatenate %12, %13, %14, %15 in 0 : vector<1x1x8x8xf32>, vector<1x1x8x8xf32>, vector<1x1x8x8xf32>, vector<1x1x8x8xf32> -> vector<4x1x8x8xf32>
    %17 = vector.extract_strided_slice %7 {offsets = [0, 0, 32], sizes = [1, 8, 8], strides = [1, 1, 1]} : vector<1x8x96xf32> to vector<1x8x8xf32>
    %18 = vector.extract_strided_slice %7 {offsets = [0, 0, 40], sizes = [1, 8, 8], strides = [1, 1, 1]} : vector<1x8x96xf32> to vector<1x8x8xf32>
    %19 = vector.extract_strided_slice %7 {offsets = [0, 0, 48], sizes = [1, 8, 8], strides = [1, 1, 1]} : vector<1x8x96xf32> to vector<1x8x8xf32>
    %20 = vector.extract_strided_slice %7 {offsets = [0, 0, 56], sizes = [1, 8, 8], strides = [1, 1, 1]} : vector<1x8x96xf32> to vector<1x8x8xf32>
    %21 = vector.shape_cast %17 : vector<1x8x8xf32> to vector<1x1x8x8xf32>
    %22 = vector.shape_cast %18 : vector<1x8x8xf32> to vector<1x1x8x8xf32>
    %23 = vector.shape_cast %19 : vector<1x8x8xf32> to vector<1x1x8x8xf32>
    %24 = vector.shape_cast %20 : vector<1x8x8xf32> to vector<1x1x8x8xf32>
    %25 = tpu.concatenate %21, %22, %23, %24 in 0 : vector<1x1x8x8xf32>, vector<1x1x8x8xf32>, vector<1x1x8x8xf32>, vector<1x1x8x8xf32> -> vector<4x1x8x8xf32>
    %26 = vector.extract_strided_slice %7 {offsets = [0, 0, 64], sizes = [1, 8, 8], strides = [1, 1, 1]} : vector<1x8x96xf32> to vector<1x8x8xf32>
    %27 = vector.extract_strided_slice %7 {offsets = [0, 0, 72], sizes = [1, 8, 8], strides = [1, 1, 1]} : vector<1x8x96xf32> to vector<1x8x8xf32>
    %28 = vector.extract_strided_slice %7 {offsets = [0, 0, 80], sizes = [1, 8, 8], strides = [1, 1, 1]} : vector<1x8x96xf32> to vector<1x8x8xf32>
    %29 = vector.extract_strided_slice %7 {offsets = [0, 0, 88], sizes = [1, 8, 8], strides = [1, 1, 1]} : vector<1x8x96xf32> to vector<1x8x8xf32>
    %30 = vector.shape_cast %26 : vector<1x8x8xf32> to vector<1x1x8x8xf32>
    %31 = vector.shape_cast %27 : vector<1x8x8xf32> to vector<1x1x8x8xf32>
    %32 = vector.shape_cast %28 : vector<1x8x8xf32> to vector<1x1x8x8xf32>
    %33 = vector.shape_cast %29 : vector<1x8x8xf32> to vector<1x1x8x8xf32>
    %34 = tpu.concatenate %30, %31, %32, %33 in 0 : vector<1x1x8x8xf32>, vector<1x1x8x8xf32>, vector<1x1x8x8xf32>, vector<1x1x8x8xf32> -> vector<4x1x8x8xf32>
    %35 = vector.shape_cast %16 : vector<4x1x8x8xf32> to vector<4x8x8xf32>
    %cst_6 = arith.constant 0.353553385 : f32
    %36 = vector.broadcast %cst_6 : f32 to vector<4x8x8xf32>
    %37 = arith.mulf %35, %36 : vector<4x8x8xf32>
    %38 = vector.shape_cast %25 : vector<4x1x8x8xf32> to vector<4x8x8xf32>
    %39 = vector.shape_cast %34 : vector<4x1x8x8xf32> to vector<4x8x8xf32>
    "tpu.trace_start"() <{level = 10 : i32, message = "bqd,bkd->bqk"}> : () -> ()
    %cst_7 = arith.constant dense<0.000000e+00> : vector<4x8x8xf32>
    %40 = tpu.matmul %37, %38, %cst_7 {dimension_numbers = #tpu.dot_dimension_numbers<[2], [2], [1], [1], [0, 0, 0, 1, 1, 1], [0], [0]>} : vector<4x8x8xf32>, vector<4x8x8xf32>, vector<4x8x8xf32> -> vector<4x8x8xf32>
    "tpu.trace_stop"() : () -> ()
    %cst_8 = arith.constant dense<0xFF800000> : vector<4x8xf32>
    %41 = vector.multi_reduction <maximumf>, %40, %cst_8 [2] : vector<4x8x8xf32> to vector<4x8xf32>
    %42 = vector.shape_cast %41 : vector<4x8xf32> to vector<4x8x1xf32>
    %43 = vector.broadcast %42 : vector<4x8x1xf32> to vector<4x8x8xf32>
    %44 = arith.subf %40, %43 : vector<4x8x8xf32>
    %45 = math.exp %44 : vector<4x8x8xf32>
    %cst_9 = arith.constant dense<0.000000e+00> : vector<4x8xf32>
    %46 = vector.multi_reduction <add>, %45, %cst_9 [2] : vector<4x8x8xf32> to vector<4x8xf32>
    %47 = vector.shape_cast %46 : vector<4x8xf32> to vector<4x8x1xf32>
    %48 = tpu.reciprocal %47 {approx = true} : vector<4x8x1xf32> -> vector<4x8x1xf32>
    "tpu.trace_start"() <{level = 10 : i32, message = "bqk,bkd->bqd"}> : () -> ()
    %cst_10 = arith.constant dense<0.000000e+00> : vector<4x8x8xf32>
    %49 = tpu.matmul %45, %39, %cst_10 {dimension_numbers = #tpu.dot_dimension_numbers<[2], [1], [1], [2], [0, 0, 0, 1, 1, 2], [0], [0]>} : vector<4x8x8xf32>, vector<4x8x8xf32>, vector<4x8x8xf32> -> vector<4x8x8xf32>
    "tpu.trace_stop"() : () -> ()
    %50 = vector.broadcast %48 : vector<4x8x1xf32> to vector<4x8x8xf32>
    %51 = arith.mulf %49, %50 : vector<4x8x8xf32>
    %52 = vector.shape_cast %51 : vector<4x8x8xf32> to vector<4x1x8x8xf32>
    %53 = vector.extract_strided_slice %52 {offsets = [0, 0, 0, 0], sizes = [1, 1, 8, 8], strides = [1, 1, 1, 1]} : vector<4x1x8x8xf32> to vector<1x1x8x8xf32>
    %54 = vector.shape_cast %53 : vector<1x1x8x8xf32> to vector<1x8x8xf32>
    %c0_11 = arith.constant 0 : index
    %c0_12 = arith.constant 0 : index
    %c0_13 = arith.constant 0 : index
    %55 = vector.load %arg15[%c0_11, %c0_12, %c0_13] : memref<1x8x32xf32, #tpu.memory_space<vmem>>, vector<1x8x8xf32>
    tpu.vector_store %arg15[%c0_11, %c0_12, %c0_13], %54 {strides = array<i32>} : memref<1x8x32xf32, #tpu.memory_space<vmem>>, vector<1x8x8xf32>,
    %56 = vector.extract_strided_slice %52 {offsets = [1, 0, 0, 0], sizes = [1, 1, 8, 8], strides = [1, 1, 1, 1]} : vector<4x1x8x8xf32> to vector<1x1x8x8xf32>
    %57 = vector.shape_cast %56 : vector<1x1x8x8xf32> to vector<1x8x8xf32>
    %c0_14 = arith.constant 0 : index
    %c0_15 = arith.constant 0 : index
    %c8 = arith.constant 8 : index
    %58 = vector.load %arg15[%c0_14, %c0_15, %c8] : memref<1x8x32xf32, #tpu.memory_space<vmem>>, vector<1x8x8xf32>
    tpu.vector_store %arg15[%c0_14, %c0_15, %c8], %57 {strides = array<i32>} : memref<1x8x32xf32, #tpu.memory_space<vmem>>, vector<1x8x8xf32>,
    %59 = vector.extract_strided_slice %52 {offsets = [2, 0, 0, 0], sizes = [1, 1, 8, 8], strides = [1, 1, 1, 1]} : vector<4x1x8x8xf32> to vector<1x1x8x8xf32>
    %60 = vector.shape_cast %59 : vector<1x1x8x8xf32> to vector<1x8x8xf32>
    %c0_16 = arith.constant 0 : index
    %c0_17 = arith.constant 0 : index
    %c16 = arith.constant 16 : index
    %61 = vector.load %arg15[%c0_16, %c0_17, %c16] : memref<1x8x32xf32, #tpu.memory_space<vmem>>, vector<1x8x8xf32>
    tpu.vector_store %arg15[%c0_16, %c0_17, %c16], %60 {strides = array<i32>} : memref<1x8x32xf32, #tpu.memory_space<vmem>>, vector<1x8x8xf32>,
    %62 = vector.extract_strided_slice %52 {offsets = [3, 0, 0, 0], sizes = [1, 1, 8, 8], strides = [1, 1, 1, 1]} : vector<4x1x8x8xf32> to vector<1x1x8x8xf32>
    %63 = vector.shape_cast %62 : vector<1x1x8x8xf32> to vector<1x8x8xf32>
    %c0_18 = arith.constant 0 : index
    %c0_19 = arith.constant 0 : index
    %c24 = arith.constant 24 : index
    %64 = vector.load %arg15[%c0_18, %c0_19, %c24] : memref<1x8x32xf32, #tpu.memory_space<vmem>>, vector<1x8x8xf32>
    tpu.vector_store %arg15[%c0_18, %c0_19, %c24], %63 {strides = array<i32>} : memref<1x8x32xf32, #tpu.memory_space<vmem>>, vector<1x8x8xf32>,
    %c0_20 = arith.constant 0 : index
    %c0_21 = arith.constant 0 : index
    %c0_22 = arith.constant 0 : index
    %65 = vector.load %arg15[%c0_20, %c0_21, %c0_22] : memref<1x8x32xf32, #tpu.memory_space<vmem>>, vector<1x8x32xf32>
    %66 = vector.shape_cast %65 : vector<1x8x32xf32> to vector<8x32xf32>
    %c0_23 = arith.constant 0 : index
    %c0_24 = arith.constant 0 : index
    %67 = vector.load %arg4[%c0_23, %c0_24] : memref<32x32xf32, #tpu.memory_space<vmem>>, vector<32x32xf32>
    %cst_25 = arith.constant dense<0.000000e+00> : vector<8x32xf32>
    %68 = tpu.matmul %66, %67, %cst_25 {dimension_numbers = #tpu.dot_dimension_numbers<[1], [0], [0], [1], [0, 0, 1, 1], [], []>} : vector<8x32xf32>, vector<32x32xf32>, vector<8x32xf32> -> vector<8x32xf32>
    %c0_26 = arith.constant 0 : index
    %c0_27 = arith.constant 0 : index
    %69 = vector.load %arg5[%c0_26, %c0_27] : memref<1x32xf32, #tpu.memory_space<vmem>>, vector<1x32xf32>
    %70 = vector.broadcast %69 : vector<1x32xf32> to vector<8x32xf32>
    %71 = arith.addf %68, %70 : vector<8x32xf32>
    %72 = arith.addf %1, %71 : vector<8x32xf32>
    %cst_28 = arith.constant dense<0.000000e+00> : vector<8xf32>
    %73 = vector.multi_reduction <add>, %72, %cst_28 [1] : vector<8x32xf32> to vector<8xf32>
    %74 = vector.shape_cast %73 : vector<8xf32> to vector<8x1xf32>
    %cst_29 = arith.constant 3.200000e+01 : f32
    %75 = vector.broadcast %cst_29 : f32 to vector<8x1xf32>
    %76 = arith.divf %74, %75 : vector<8x1xf32>
    %77 = vector.broadcast %76 : vector<8x1xf32> to vector<8x32xf32>
    %78 = arith.subf %72, %77 : vector<8x32xf32>
    %79 = arith.mulf %78, %78 : vector<8x32xf32>
    %cst_30 = arith.constant dense<0.000000e+00> : vector<8xf32>
    %80 = vector.multi_reduction <add>, %79, %cst_30 [1] : vector<8x32xf32> to vector<8xf32>
    %81 = vector.shape_cast %80 : vector<8xf32> to vector<8x1xf32>
    %cst_31 = arith.constant 3.200000e+01 : f32
    %82 = vector.broadcast %cst_31 : f32 to vector<8x1xf32>
    %83 = arith.divf %81, %82 : vector<8x1xf32>
    %84 = vector.broadcast %76 : vector<8x1xf32> to vector<8x32xf32>
    %85 = arith.subf %72, %84 : vector<8x32xf32>
    %cst_32 = arith.constant 9.99999974E-6 : f32
    %86 = vector.broadcast %cst_32 : f32 to vector<8x1xf32>
    %87 = arith.addf %83, %86 : vector<8x1xf32>
    %88 = math.rsqrt %87 : vector<8x1xf32>
    %89 = vector.broadcast %88 : vector<8x1xf32> to vector<8x32xf32>
    %90 = arith.mulf %85, %89 : vector<8x32xf32>
    %c0_33 = arith.constant 0 : index
    %c0_34 = arith.constant 0 : index
    %91 = vector.load %arg10[%c0_33, %c0_34] : memref<1x32xf32, #tpu.memory_space<vmem>>, vector<1x32xf32>
    %92 = vector.broadcast %91 : vector<1x32xf32> to vector<8x32xf32>
    %93 = arith.mulf %90, %92 : vector<8x32xf32>
    %c0_35 = arith.constant 0 : index
    %c0_36 = arith.constant 0 : index
    %94 = vector.load %arg11[%c0_35, %c0_36] : memref<1x32xf32, #tpu.memory_space<vmem>>, vector<1x32xf32>
    %95 = vector.broadcast %94 : vector<1x32xf32> to vector<8x32xf32>
    %96 = arith.addf %93, %95 : vector<8x32xf32>
    %c0_37 = arith.constant 0 : index
    %c0_38 = arith.constant 0 : index
    %97 = vector.load %arg6[%c0_37, %c0_38] : memref<32x128xf32, #tpu.memory_space<vmem>>, vector<32x128xf32>
    %cst_39 = arith.constant dense<0.000000e+00> : vector<8x128xf32>
    %98 = tpu.matmul %96, %97, %cst_39 {dimension_numbers = #tpu.dot_dimension_numbers<[1], [0], [0], [1], [0, 0, 1, 1], [], []>} : vector<8x32xf32>, vector<32x128xf32>, vector<8x128xf32> -> vector<8x128xf32>
    %c0_40 = arith.constant 0 : index
    %c0_41 = arith.constant 0 : index
    %99 = vector.load %arg7[%c0_40, %c0_41] : memref<1x128xf32, #tpu.memory_space<vmem>>, vector<1x128xf32>
    %100 = vector.broadcast %99 : vector<1x128xf32> to vector<8x128xf32>
    %101 = arith.addf %98, %100 : vector<8x128xf32>
    %cst_42 = arith.constant 0.000000e+00 : f32
    %102 = vector.broadcast %cst_42 : f32 to vector<8x128xf32>
    %103 = arith.maximumf %101, %102 : vector<8x128xf32>
    %c0_43 = arith.constant 0 : index
    %c0_44 = arith.constant 0 : index
    %104 = vector.load %arg8[%c0_43, %c0_44] : memref<128x32xf32, #tpu.memory_space<vmem>>, vector<128x32xf32>
    %cst_45 = arith.constant dense<0.000000e+00> : vector<8x32xf32>
    %105 = tpu.matmul %103, %104, %cst_45 {dimension_numbers = #tpu.dot_dimension_numbers<[1], [0], [0], [1], [0, 0, 1, 1], [], []>} : vector<8x128xf32>, vector<128x32xf32>, vector<8x32xf32> -> vector<8x32xf32>
    %c0_46 = arith.constant 0 : index
    %c0_47 = arith.constant 0 : index
    %106 = vector.load %arg9[%c0_46, %c0_47] : memref<1x32xf32, #tpu.memory_space<vmem>>, vector<1x32xf32>
    %107 = vector.broadcast %106 : vector<1x32xf32> to vector<8x32xf32>
    %108 = arith.addf %105, %107 : vector<8x32xf32>
    %109 = arith.addf %96, %108 : vector<8x32xf32>
    %cst_48 = arith.constant dense<0.000000e+00> : vector<8xf32>
    %110 = vector.multi_reduction <add>, %109, %cst_48 [1] : vector<8x32xf32> to vector<8xf32>
    %111 = vector.shape_cast %110 : vector<8xf32> to vector<8x1xf32>
    %cst_49 = arith.constant 3.200000e+01 : f32
    %112 = vector.broadcast %cst_49 : f32 to vector<8x1xf32>
    %113 = arith.divf %111, %112 : vector<8x1xf32>
    %114 = vector.broadcast %113 : vector<8x1xf32> to vector<8x32xf32>
    %115 = arith.subf %109, %114 : vector<8x32xf32>
    %116 = arith.mulf %115, %115 : vector<8x32xf32>
    %cst_50 = arith.constant dense<0.000000e+00> : vector<8xf32>
    %117 = vector.multi_reduction <add>, %116, %cst_50 [1] : vector<8x32xf32> to vector<8xf32>
    %118 = vector.shape_cast %117 : vector<8xf32> to vector<8x1xf32>
    %cst_51 = arith.constant 3.200000e+01 : f32
    %119 = vector.broadcast %cst_51 : f32 to vector<8x1xf32>
    %120 = arith.divf %118, %119 : vector<8x1xf32>
    %121 = vector.broadcast %113 : vector<8x1xf32> to vector<8x32xf32>
    %122 = arith.subf %109, %121 : vector<8x32xf32>
    %cst_52 = arith.constant 9.99999974E-6 : f32
    %123 = vector.broadcast %cst_52 : f32 to vector<8x1xf32>
    %124 = arith.addf %120, %123 : vector<8x1xf32>
    %125 = math.rsqrt %124 : vector<8x1xf32>
    %126 = vector.broadcast %125 : vector<8x1xf32> to vector<8x32xf32>
    %127 = arith.mulf %122, %126 : vector<8x32xf32>
    %c0_53 = arith.constant 0 : index
    %c0_54 = arith.constant 0 : index
    %128 = vector.load %arg12[%c0_53, %c0_54] : memref<1x32xf32, #tpu.memory_space<vmem>>, vector<1x32xf32>
    %129 = vector.broadcast %128 : vector<1x32xf32> to vector<8x32xf32>
    %130 = arith.mulf %127, %129 : vector<8x32xf32>
    %c0_55 = arith.constant 0 : index
    %c0_56 = arith.constant 0 : index
    %131 = vector.load %arg13[%c0_55, %c0_56] : memref<1x32xf32, #tpu.memory_space<vmem>>, vector<1x32xf32>
    %132 = vector.broadcast %131 : vector<1x32xf32> to vector<8x32xf32>
    %133 = arith.addf %130, %132 : vector<8x32xf32>
    %134 = vector.shape_cast %133 : vector<8x32xf32> to vector<1x8x32xf32>
    %c0_57 = arith.constant 0 : index
    %c0_58 = arith.constant 0 : index
    %c0_59 = arith.constant 0 : index
    %135 = vector.load %arg14[%c0_57, %c0_58, %c0_59] : memref<1x8x32xf32, #tpu.memory_space<vmem>>, vector<1x8x32xf32>
    tpu.vector_store %arg14[%c0_57, %c0_58, %c0_59], %134 {strides = array<i32>} : memref<1x8x32xf32, #tpu.memory_space<vmem>>, vector<1x8x32xf32>,
    return
  }
  func.func @transform_0(%arg0: i32) -> (i32, i32, i32) {
    %c0_i32 = arith.constant 0 : i32
    %c0_i32_0 = arith.constant 0 : i32
    %c0_i32_1 = arith.constant 0 : i32
    return %arg0, %c0_i32, %c0_i32_0 : i32, i32, i32
  }
  func.func @transform_1(%arg0: i32) -> (i32, i32) {
    %c0_i32 = arith.constant 0 : i32
    %c0_i32_0 = arith.constant 0 : i32
    %c0_i32_1 = arith.constant 0 : i32
    return %c0_i32, %c0_i32_0 : i32, i32
  }
  func.func @transform_2(%arg0: i32) -> (i32, i32) {
    %c0_i32 = arith.constant 0 : i32
    %c0_i32_0 = arith.constant 0 : i32
    %c0_i32_1 = arith.constant 0 : i32
    return %c0_i32, %c0_i32_0 : i32, i32
  }
  func.func @transform_3(%arg0: i32) -> (i32, i32) {
    %c0_i32 = arith.constant 0 : i32
    %c0_i32_0 = arith.constant 0 : i32
    %c0_i32_1 = arith.constant 0 : i32
    return %c0_i32, %c0_i32_0 : i32, i32
  }
  func.func @transform_4(%arg0: i32) -> (i32, i32) {
    %c0_i32 = arith.constant 0 : i32
    %c0_i32_0 = arith.constant 0 : i32
    %c0_i32_1 = arith.constant 0 : i32
    return %c0_i32, %c0_i32_0 : i32, i32
  }
  func.func @transform_5(%arg0: i32) -> (i32, i32) {
    %c0_i32 = arith.constant 0 : i32
    %c0_i32_0 = arith.constant 0 : i32
    %c0_i32_1 = arith.constant 0 : i32
    return %c0_i32, %c0_i32_0 : i32, i32
  }
  func.func @transform_6(%arg0: i32) -> (i32, i32) {
    %c0_i32 = arith.constant 0 : i32
    %c0_i32_0 = arith.constant 0 : i32
    %c0_i32_1 = arith.constant 0 : i32
    return %c0_i32, %c0_i32_0 : i32, i32
  }
  func.func @transform_7(%arg0: i32) -> (i32, i32) {
    %c0_i32 = arith.constant 0 : i32
    %c0_i32_0 = arith.constant 0 : i32
    %c0_i32_1 = arith.constant 0 : i32
    return %c0_i32, %c0_i32_0 : i32, i32
  }
  func.func @transform_8(%arg0: i32) -> (i32, i32) {
    %c0_i32 = arith.constant 0 : i32
    %c0_i32_0 = arith.constant 0 : i32
    %c0_i32_1 = arith.constant 0 : i32
    return %c0_i32, %c0_i32_0 : i32, i32
  }
  func.func @transform_9(%arg0: i32) -> (i32, i32) {
    %c0_i32 = arith.constant 0 : i32
    %c0_i32_0 = arith.constant 0 : i32
    %c0_i32_1 = arith.constant 0 : i32
    return %c0_i32, %c0_i32_0 : i32, i32
  }
  func.func @transform_10(%arg0: i32) -> (i32, i32) {
    %c0_i32 = arith.constant 0 : i32
    %c0_i32_0 = arith.constant 0 : i32
    %c0_i32_1 = arith.constant 0 : i32
    return %c0_i32, %c0_i32_0 : i32, i32
  }
  func.func @transform_11(%arg0: i32) -> (i32, i32) {
    %c0_i32 = arith.constant 0 : i32
    %c0_i32_0 = arith.constant 0 : i32
    %c0_i32_1 = arith.constant 0 : i32
    return %c0_i32, %c0_i32_0 : i32, i32
  }
  func.func @transform_12(%arg0: i32) -> (i32, i32) {
    %c0_i32 = arith.constant 0 : i32
    %c0_i32_0 = arith.constant 0 : i32
    %c0_i32_1 = arith.constant 0 : i32
    return %c0_i32, %c0_i32_0 : i32, i32
  }
  func.func @transform_13(%arg0: i32) -> (i32, i32, i32) {
    %c0_i32 = arith.constant 0 : i32
    %c0_i32_0 = arith.constant 0 : i32
    %c0_i32_1 = arith.constant 0 : i32
    return %arg0, %c0_i32, %c0_i32_0 : i32, i32, i32
  }
}

</mosaic_0001>

<bundles_post_ra>
// kernel: transformer_block.1
= control target key start
LH: loop header
LB: loop body
LE: loop exit
PB: predicated region body
PF: predicated region fallthrough
CT: control target
= control target key end

     0   :  { %v1392_v1 = vmov 0.0   ;;  %vm1393_vm0 = vmmov 0   ;;  %s1684_s0 = inlined_call_operand.vmem [shape: f32[1,8,32], index: 0, kind: input, shape index: {}]   ;;  %s1685_s1 = inlined_call_operand.vmem [shape: f32[32,96], index: 1, kind: input, shape index: {}]   ;;  %s1686_s2 = inlined_call_operand.vmem [shape: f32[1,96], index: 2, kind: input, shape index: {}]   ;;  %s1687_s3 = inlined_call_operand.vmem [shape: f32[32,32], index: 3, kind: input, shape index: {}]   ;;  %s1688_s4 = inlined_call_operand.vmem [shape: f32[1,32], index: 4, kind: input, shape index: {}]   ;;  %s1689_s5 = inlined_call_operand.vmem [shape: f32[32,128], index: 5, kind: input, shape index: {}]   ;;  %s1690_s6 = inlined_call_operand.vmem [shape: f32[1,128], index: 6, kind: input, shape index: {}]   ;;  %s1691_s7 = inlined_call_operand.vmem [shape: f32[128,32], index: 7, kind: input, shape index: {}]   ;;  %s1692_s8 = inlined_call_operand.vmem [shape: f32[1,32], index: 8, kind: input, shape index: {}]   ;;  %s1693_s9 = inlined_call_operand.vmem [shape: f32[1,32], index: 9, kind: input, shape index: {}]   ;;  %s1694_s10 = inlined_call_operand.vmem [shape: f32[1,32], index: 10, kind: input, shape index: {}]   ;;  %s1695_s11 = inlined_call_operand.vmem [shape: f32[1,32], index: 11, kind: input, shape index: {}]   ;;  %s1696_s12 = inlined_call_operand.vmem [shape: f32[1,32], index: 12, kind: input, shape index: {}]   ;;  %s1697_s13 = inlined_call_operand.hbm [shape: f32[1,8,32], index: 13, kind: output, shape index: {}]  }
   0x1   :  { %v49_v0 = vld [vmem:[%s1685_s1 + $0x18] sm:$0xff]  ;;  %1231 = vmatprep.subr.mxu1 %v1392_v1  ;;  %v48_v2 = vld [vmem:[%s1685_s1 + $0x10] sm:$0xff]  ;;  %1239 = vmatprep.mubr.msk.f32.mxu1 %vm1393_vm0, %v1392_v1 }
   0x2   :  { %1232 = vmatpush3.msra.mxu1 %v49_v0  ;;  %1252 = vmatprep.subr.mxu0 %v1392_v1 }
   0x3   :  { %18 = vsyncpa [#allocation4], 0  ;;  %1233 = vmatprep.subr.mxu1 %v1392_v1  ;;  %v47_v3 = vld [vmem:[%s1685_s1 + $0x8] sm:$0xff]  ;;  %1254 = vmatprep.mubr.msk.f32.mxu0 %vm1393_vm0, %v1392_v1  ;;  %v46_v4 = vld [vmem:[%s1685_s1] sm:$0xff]  ;;  %vm57_vm1 = vcmask 261120   ;;  %s1395_s19 = smov 120  }
   0x4   :  { %1234 = vmatpush3.msra.mxu1 %v48_v2  ;;  %v1496_v5 = vld [vmem:[%s1684_s0] sm:$0xff]  ;;  %s1394_s0 = smov 104   ;;  %s1396_s20 = smov 96   ;;  %vm147_vm2 = vcmask 64512   ;;  %v825_v2 = vld [vmem:[%s1687_s3 + $0x18] sm:$0xff]  ;;  %vm807_vm3 = vcmask 130112  }
   0x5   :  { %1235 = vmatprep.subr.mxu1 %v1392_v1  ;;  %v1160_v6 = vld [vmem:[%s1686_s2] ss:$0 sm:$0xff]  ;;  %s1397_s21 = smov 112   ;;  %s1398_s2 = smov 64   ;;  %vm813_vm4 = vcmask 195712   ;;  %vm819_vm5 = vcmask 261312  }
   0x6   :  { %1236 = vmatpush3.msra.mxu1 %v47_v3  ;;  %v824_v3 = vld [vmem:[%s1687_s3 + $0x10] sm:$0xff]  ;;  %s1399_s28 = smov 8   ;;  %s1400_s14 = smov 16  }
   0x7   :  { %1237 = vmatprep.subr.mxu1 %v1392_v1  ;;  %s1401_s15 = smov 24   ;;  %s1402_s18 = smov [#allocation3]  }
   0x8   :  { %1238 = vmatpush3.msra.mxu1 %v46_v4 }
   0x9   :  { %1240 = vmatmul.mubr.msk.f32.vlgmr.msra.gmra.mxu1 %vm57_vm1, %v1496_v5  ;;  %1242 = vmatprep.subr.mxu1 %v1392_v1 }
   0xa   :  { %1244 = vmatprep.mubr.msk.f32.mxu1 %vm1393_vm0, %v1392_v1 }
  0xc9   :  { %v127_v7 = vpop.f32.mrf.mxu1 }
  0xca   :  { %v128_v8 = vadd.f32 %v1160_v6, %v127_v7 }
  0xcb   :  { %v1241_v9 = vpop.f32.mrf.mxu1 }
  0xcc   :  { %138 = vrot.lane.b32.xlu1 %v128_v8, %s1394_s0  ;;  %132 = vrot.lane.b32.xlu0 %v128_v8, %s1395_s19  ;;  %v141_v14 = vmul.f32 0.35355338, %v128_v8 }
  0xd0   :  { %145 = vrot.lane.b32.xlu1 %v128_v8, %s1396_s20  ;;  %135 = vrot.lane.b32.xlu0 %v128_v8, %s1397_s21 }
 0x13e   :  { %v139_v10 = vpop.permute.xlu1 %138  ;;  %v133_v11 = vpop.permute.xlu0 %132 }
 0x13f   :  { %223 = vrot.lane.b32.xlu0 %v133_v11, %s1396_s20  ;;  %v142_v16 = vmul.f32 0.35355338, %v133_v11  ;;  %v144_v19 = vmul.f32 0.35355338, %v139_v10 }
 0x142   :  { %v146_v12 = vpop.permute.xlu1 %145  ;;  %v136_v13 = vpop.permute.xlu0 %135 }
 0x143   :  { %1243 = vmatpush3.xpose.msk.msra.mxu1 %vm147_vm2, %v146_v12  ;;  %377 = vrot.lane.b32.xlu0 %v139_v10, %s1396_s20  ;;  %v143_v20 = vmul.f32 0.35355338, %v136_v13 }
 0x144   :  { %300 = vrot.lane.b32.xlu1 %v136_v13, %s1396_s20  ;;  %1247 = vmatprep.subr.mxu1 %v1392_v1 }
 0x146   :  { %1245 = vmatmul.mubr.msk.f32.vlgmr.msra.gmra.mxu1 %vm147_vm2, %v141_v14 }
 0x147   :  { %494 = vrot.lane.b32.xlu0 %v128_v8, %s1398_s2  ;;  %1249 = vmatprep.mubr.msk.f32.mxu1 %vm1393_vm0, %v1392_v1  ;;  %v823_v8 = vld [vmem:[%s1687_s3 + $0x8] sm:$0xff] }
 0x148   :  { %570 = vrot.lane.b32.xlu1 %v133_v11, %s1398_s2 }
 0x1b1   :  { %v224_v15 = vpop.permute.xlu0 %223 }
 0x1b2   :  { %1248 = vmatpush3.xpose.msk.msra.mxu1 %vm147_vm2, %v224_v15 }
 0x1b3   :  { %1257 = vmatprep.subr.mxu1 %v1392_v1 }
 0x1b5   :  { %v378_v17 = vpop.permute.xlu0 %377  ;;  %1250 = vmatmul.mubr.msk.f32.vlgmr.msra.gmra.mxu1 %vm147_vm2, %v142_v16 }
 0x1b6   :  { %v301_v18 = vpop.permute.xlu1 %300  ;;  %1258 = vmatpush3.xpose.msk.msra.mxu1 %vm147_vm2, %v378_v17  ;;  %1259 = vmatprep.mubr.msk.f32.mxu1 %vm1393_vm0, %v1392_v1 }
 0x1b7   :  { %1253 = vmatpush3.xpose.msk.msra.mxu0 %vm147_vm2, %v301_v18  ;;  %1267 = vmatprep.subr.mxu1 %v1392_v1 }
 0x1b8   :  { %1262 = vmatprep.subr.mxu0 %v1392_v1 }
 0x1b9   :  { %v495_v21 = vpop.permute.xlu0 %494  ;;  %1260 = vmatmul.mubr.msk.f32.vlgmr.msra.gmra.mxu1 %vm147_vm2, %v144_v19 }
 0x1ba   :  { %1255 = vmatmul.mubr.msk.f32.vlgmr.msra.gmra.mxu0 %vm147_vm2, %v143_v20  ;;  %v571_v22 = vpop.permute.xlu1 %570  ;;  %1269 = vmatprep.mubr.msk.f32.mxu1 %vm1393_vm0, %v1392_v1 }
 0x1bb   :  { %1263 = vmatpush3.msra.mxu0 %v495_v21  ;;  %1268 = vmatpush3.msra.mxu1 %v571_v22 }
 0x1bc   :  { %1264 = vmatprep.mubr.msk.f32.mxu0 %vm1393_vm0, %v1392_v1  ;;  %1272 = vmatprep.subr.mxu0 %v1392_v1 }
 0x1bd   :  { %1277 = vmatprep.subr.mxu1 %v1392_v1 }
 0x206   :  { %v219_v23 = vpop.f32.mrf.mxu1 }
 0x207   :  { %v454_v24 = vsel %vm147_vm2, %v219_v23, -inf }
 0x208   :  { %455 = vmax.xlane.f32.xlu1 %v454_v24  ;;  %v1246_v25 = vpop.f32.mrf.mxu1 }
 0x275   :  { %v296_v26 = vpop.f32.mrf.mxu1 }
 0x276   :  { %v457_v27 = vsel %vm147_vm2, %v296_v26, -inf }
 0x277   :  { %458 = vmax.xlane.f32.xlu0 %v457_v27  ;;  %v1251_v28 = vpop.f32.mrf.mxu1 }
 0x279   :  { %v450_v29 = vpop.f32.mrf.mxu1 }
 0x27a   :  { %v373_v30 = vpop.f32.mrf.mxu0  ;;  %v463_v31 = vsel %vm147_vm2, %v450_v29, -inf }
 0x27b   :  { %v460_v32 = vsel %vm147_vm2, %v373_v30, -inf  ;;  %464 = vmax.xlane.f32.xlu1 %v463_v31  ;;  %v1261_v33 = vpop.f32.mrf.mxu1 }
 0x27c   :  { %v1256_v34 = vpop.f32.mrf.mxu0  ;;  %461 = vmax.xlane.f32.xlu0 %v460_v32 }
 0x27d   :  { %v940_v34 = vld [vmem:[%s1689_s5 + $0x18] sm:$0xff] }
 0x28c   :  { %646 = vrot.lane.b32.xlu1 %v136_v13, %s1398_s2 }
 0x291   :  { %v456_v35 = vpop.xlane.xlu1 %455 }
 0x292   :  { %v466_v36 = vsub.f32 %v219_v23, %v456_v35  ;;  %722 = vrot.lane.b32.xlu0 %v139_v10, %s1398_s2  ;;  %v822_v10 = vld [vmem:[%s1687_s3] sm:$0xff]  ;;  %v938_v35 = vld [vmem:[%s1689_s5 + $0x8] sm:$0xff] }
 0x293   :  { %v1174_v23 = vld [vmem:[%s1688_s4] ss:$0 sm:$0xff]  ;;  %s1152_s4 = sshll.u32 %s1402_s18, 4  ;;  %s1153_s4 = int_to_ptr.vmem [resolvable:$true] %s1152_s4 }
 0x294   :  { %v470_v37 = vmul.f32 1.442695, %v466_v36  ;;  %v937_v36 = vld [vmem:[%s1689_s5] sm:$0xff]  ;;  %s1370_s1 = scalar_lea.vmem %s1153_s4, 128  ;;  %p1375_p1 = scmp.lt.s32.totalorder %s1153_s4, %s1153_s4 }
 0x295   :  { %p1371_p0 = scmp.ne.s32.totalorder %s1153_s4, %s1370_s1  ;;  %p1376_p2 = scmp.lt.s32.totalorder %s1370_s1, %s1370_s1 }
 0x296   :  { %1350 = vpow2.f32 %v470_v37  ;;  %v1037_v37 = vld [vmem:[%s1691_s7 + $0x78] sm:$0xff] }
 0x297   :  { %p1377_p3 = por %p1376_p2, %p1375_p1 }
 0x299   :  { %p1378_p4 = pnand %p1377_p3, %p1371_p0 }
 0x2a3   :  { %v1351_v38 = vpop.eup %1350 }
 0x2a4   :  { %1265 = vmatmul.mubr.msk.f32.vlgmr.msra.gmra.mxu0 %vm147_vm2, %v1351_v38  ;;  %v478_v54 = vsel %vm147_vm2, %v1351_v38, 0.0  ;;  %v1036_v38 = vld [vmem:[%s1691_s7 + $0x70] sm:$0xff] }
 0x2a5   :  { %1274 = vmatprep.mubr.msk.f32.mxu0 %vm1393_vm0, %v1392_v1 }
 0x300   :  { %v459_v39 = vpop.xlane.xlu0 %458 }
 0x301   :  { %v467_v40 = vsub.f32 %v296_v26, %v459_v39  ;;  %v1035_v39 = vld [vmem:[%s1691_s7 + $0x68] sm:$0xff] }
 0x303   :  { %v472_v41 = vmul.f32 1.442695, %v467_v40  ;;  %v1034_v40 = vld [vmem:[%s1691_s7 + $0x60] sm:$0xff] }
 0x304   :  { %v465_v42 = vpop.xlane.xlu1 %464 }
 0x305   :  { %1352 = vpow2.f32 %v472_v41  ;;  %v462_v43 = vpop.xlane.xlu0 %461  ;;  %v469_v44 = vsub.f32 %v450_v29, %v465_v42  ;;  %v1033_v41 = vld [vmem:[%s1691_s7 + $0x58] sm:$0xff]  ;;  %v1032_v42 = vld [vmem:[%s1691_s7 + $0x50] sm:$0xff] }
 0x306   :  { %v468_v45 = vsub.f32 %v373_v30, %v462_v43  ;;  %v1031_v43 = vld [vmem:[%s1691_s7 + $0x48] sm:$0xff] }
 0x307   :  { %v476_v46 = vmul.f32 1.442695, %v469_v44  ;;  %v1030_v44 = vld [vmem:[%s1691_s7 + $0x40] sm:$0xff] }
 0x308   :  { %v474_v47 = vmul.f32 1.442695, %v468_v45  ;;  %v647_v48 = vpop.permute.xlu1 %646  ;;  %v1029_v45 = vld [vmem:[%s1691_s7 + $0x38] sm:$0xff] }
 0x309   :  { %1354 = vpow2.f32 %v476_v46  ;;  %1273 = vmatpush3.msra.mxu0 %v647_v48  ;;  %v723_v50 = vpop.permute.xlu0 %722  ;;  %v1028_v46 = vld [vmem:[%s1691_s7 + $0x30] sm:$0xff]  ;;  %v1026_v48 = vld [vmem:[%s1691_s7 + $0x20] sm:$0xff] }
 0x30a   :  { %1356 = vpow2.f32 %v474_v47  ;;  %1304 = vmatprep.subr.mxu0 %v1392_v1  ;;  %v1027_v47 = vld [vmem:[%s1691_s7 + $0x28] sm:$0xff] }
 0x312   :  { %v1353_v49 = vpop.eup %1352 }
 0x313   :  { %1270 = vmatmul.mubr.msk.f32.vlgmr.msra.gmra.mxu1 %vm147_vm2, %v1353_v49  ;;  %v481_v51 = vsel %vm147_vm2, %v1353_v49, 0.0  ;;  %v1025_v49 = vld [vmem:[%s1691_s7 + $0x18] sm:$0xff] }
 0x314   :  { %1278 = vmatpush3.msra.mxu1 %v723_v50  ;;  %482 = vadd.xlane.f32.xlu1 %v481_v51 }
 0x315   :  { %1279 = vmatprep.mubr.msk.f32.mxu1 %vm1393_vm0, %v1392_v1  ;;  %1282 = vmatprep.subr.mxu1 %v1392_v1 }
 0x316   :  { %v1355_v52 = vpop.eup %1354 }
 0x317   :  { %v1357_v53 = vpop.eup %1356  ;;  %1280 = vmatmul.mubr.msk.f32.vlgmr.msra.gmra.mxu1 %vm147_vm2, %v1355_v52  ;;  %v487_v56 = vsel %vm147_vm2, %v1355_v52, 0.0 }
 0x318   :  { %1275 = vmatmul.mubr.msk.f32.vlgmr.msra.gmra.mxu0 %vm147_vm2, %v1357_v53  ;;  %v484_v55 = vsel %vm147_vm2, %v1357_v53, 0.0  ;;  %479 = vadd.xlane.f32.xlu1 %v478_v54  ;;  %v1176_v54 = vld [vmem:[%s1693_s9] ss:$0 sm:$0xff] }
 0x319   :  { %485 = vadd.xlane.f32.xlu0 %v484_v55  ;;  %1290 = vmatprep.mubr.msk.f32.mxu1 %vm1393_vm0, %v1392_v1 }
 0x31a   :  { %1336 = vmatprep.mubr.msk.f32.mxu0 %vm1393_vm0, %v1392_v1  ;;  %1283 = vmatpush3.msra.mxu1 %v825_v2 }
 0x31b   :  { %1284 = vmatprep.subr.mxu1 %v1392_v1  ;;  %1305 = vmatpush3.msra.mxu0 %v1037_v37 }
 0x31c   :  { %1285 = vmatpush3.msra.mxu1 %v824_v3  ;;  %1306 = vmatprep.subr.mxu0 %v1392_v1 }
 0x31d   :  { %488 = vadd.xlane.f32.xlu0 %v487_v56  ;;  %1286 = vmatprep.subr.mxu1 %v1392_v1  ;;  %v1177_v56 = vld [vmem:[%s1694_s10] ss:$0 sm:$0xff] }
 0x31e   :  { %1287 = vmatpush3.msra.mxu1 %v823_v8  ;;  %1307 = vmatpush3.msra.mxu0 %v1036_v38 }
 0x31f   :  { %1288 = vmatprep.subr.mxu1 %v1392_v1  ;;  %1308 = vmatprep.subr.mxu0 %v1392_v1 }
 0x320   :  { %1289 = vmatpush3.msra.mxu1 %v822_v10  ;;  %1309 = vmatpush3.msra.mxu0 %v1035_v39 }
 0x321   :  { %1293 = vmatprep.subr.mxu1 %v1392_v1  ;;  %1310 = vmatprep.subr.mxu0 %v1392_v1 }
 0x322   :  { %1311 = vmatpush3.msra.mxu0 %v1034_v40 }
 0x323   :  { %1312 = vmatprep.subr.mxu0 %v1392_v1 }
 0x324   :  { %1313 = vmatpush3.msra.mxu0 %v1033_v41 }
 0x325   :  { %1314 = vmatprep.subr.mxu0 %v1392_v1 }
 0x326   :  { %1315 = vmatpush3.msra.mxu0 %v1032_v42 }
 0x327   :  { %1316 = vmatprep.subr.mxu0 %v1392_v1 }
 0x328   :  { %1317 = vmatpush3.msra.mxu0 %v1031_v43 }
 0x329   :  { %1318 = vmatprep.subr.mxu0 %v1392_v1 }
 0x32a   :  { %1319 = vmatpush3.msra.mxu0 %v1030_v44 }
 0x32b   :  { %1320 = vmatprep.subr.mxu0 %v1392_v1 }
 0x32c   :  { %1321 = vmatpush3.msra.mxu0 %v1029_v45 }
 0x32d   :  { %1322 = vmatprep.subr.mxu0 %v1392_v1 }
 0x32e   :  { %1323 = vmatpush3.msra.mxu0 %v1028_v46 }
 0x32f   :  { %1324 = vmatprep.subr.mxu0 %v1392_v1 }
 0x330   :  { %1325 = vmatpush3.msra.mxu0 %v1027_v47 }
 0x331   :  { %1326 = vmatprep.subr.mxu0 %v1392_v1 }
 0x332   :  { %1327 = vmatpush3.msra.mxu0 %v1026_v48 }
 0x333   :  { %1328 = vmatprep.subr.mxu0 %v1392_v1 }
 0x334   :  { %1329 = vmatpush3.msra.mxu0 %v1025_v49 }
 0x335   :  { %1330 = vmatprep.subr.mxu0 %v1392_v1 }
 0x364   :  { %v566_v57 = vpop.f32.mrf.mxu0 }
 0x366   :  { %v1266_v58 = vpop.f32.mrf.mxu0 }
 0x39d   :  { %v483_v59 = vpop.xlane.xlu1 %482 }
 0x3a1   :  { %v480_v60 = vpop.xlane.xlu1 %479 }
 0x3a2   :  { %1358 = vrcp.f32 %v480_v60  ;;  %v486_v63 = vpop.xlane.xlu0 %485  ;;  %v1023_v60 = vld [vmem:[%s1691_s7 + $0x8] sm:$0xff] }
 0x3a3   :  { %1360 = vrcp.f32 %v483_v59  ;;  %v1024_v59 = vld [vmem:[%s1691_s7 + $0x10] sm:$0xff] }
 0x3a4   :  { %1362 = vrcp.f32 %v486_v63  ;;  %1331 = vmatpush3.msra.mxu0 %v1024_v59 }
 0x3a5   :  { %1332 = vmatprep.subr.mxu0 %v1392_v1 }
 0x3a6   :  { %v489_v0 = vpop.xlane.xlu0 %488  ;;  %1333 = vmatpush3.msra.mxu0 %v1023_v60 }
 0x3a7   :  { %1364 = vrcp.f32 %v489_v0  ;;  %1334 = vmatprep.subr.mxu0 %v1392_v1 }
 0x3af   :  { %v1359_v61 = vpop.eup %1358 }
 0x3b0   :  { %v798_v62 = vmul.f32 %v1359_v61, %v566_v57  ;;  %v1361_v4 = vpop.eup %1360  ;;  %v1022_v61 = vld [vmem:[%s1691_s7] sm:$0xff] }
 0x3b1   :  { %v1363_v12 = vpop.eup %1362  ;;  %1335 = vmatpush3.msra.mxu0 %v1022_v61 }
 0x3b2   :  { %802 = vst.msk [vmem:[#allocation2] sm:$0xff] %vm147_vm2, %v798_v62  ;;  %v1178_v62 = vld [vmem:[%s1690_s6] ss:$0 sm:$0xff] }
 0x3b4   :  { %v1365_v17 = vpop.eup %1364 }
 0x3d3   :  { %v642_v6 = vpop.f32.mrf.mxu1 }
 0x3d4   :  { %v799_v7 = vmul.f32 %v1361_v4, %v642_v6  ;;  %v1180_v4 = vld [vmem:[%s1692_s8] ss:$0 sm:$0xff] }
 0x3d5   :  { %v1271_v9 = vpop.f32.mrf.mxu1 }
 0x3d6   :  { %804 = vrot.lane.b32.xlu0 %v799_v7, %s1399_s28 }
 0x3d7   :  { %v794_v11 = vpop.f32.mrf.mxu1 }
 0x3d8   :  { %v718_v13 = vpop.f32.mrf.mxu0  ;;  %v801_v18 = vmul.f32 %v1365_v17, %v794_v11 }
 0x3d9   :  { %v800_v14 = vmul.f32 %v1363_v12, %v718_v13  ;;  %v1281_v15 = vpop.f32.mrf.mxu1 }
 0x3da   :  { %v1276_v16 = vpop.f32.mrf.mxu0 }
 0x3db   :  { %810 = vrot.lane.b32.xlu1 %v800_v14, %s1400_s14 }
 0x3df   :  { %816 = vrot.lane.b32.xlu1 %v801_v18, %s1401_s15 }
 0x448   :  { %v805_v19 = vpop.permute.xlu0 %804 }
 0x449   :  { %808 = vst.msk [vmem:[#allocation2] sm:$0xff] %vm807_vm3, %v805_v19  ;;  %v1181_v19 = vld [vmem:[%s1695_s11] ss:$0 sm:$0xff] }
 0x44d   :  { %v811_v20 = vpop.permute.xlu1 %810 }
 0x44e   :  { %814 = vst.msk [vmem:[#allocation2] sm:$0xff] %vm813_vm4, %v811_v20 }
 0x451   :  { %v817_v21 = vpop.permute.xlu1 %816 }
 0x452   :  { %820 = vst.msk [vmem:[#allocation2] sm:$0xff] %vm819_vm5, %v817_v21  ;;  %v1182_v21 = vld [vmem:[%s1696_s12] ss:$0 sm:$0xff] }
 0x459   :  { %v821_v22 = vld [vmem:[#allocation2] sm:$0xff] }
 0x45a   :  { %1291 = vmatmul.mubr.msk.f32.vlgmr.msra.gmra.mxu1 %vm57_vm1, %v821_v22 }
 0x45b   :  { %1301 = vmatprep.mubr.msk.f32.mxu1 %vm1393_vm0, %v1392_v1  ;;  %1294 = vmatpush3.msra.mxu1 %v940_v34 }
 0x45c   :  { %1295 = vmatprep.subr.mxu1 %v1392_v1 }
 0x51a   :  { %v902_v24 = vpop.f32.mrf.mxu1 }
 0x51b   :  { %v903_v25 = vadd.f32 %v1174_v23, %v902_v24 }
 0x51c   :  { %v1292_v26 = vpop.f32.mrf.mxu1 }
 0x51d   :  { %v906_v27 = vadd.f32 %v903_v25, %v1496_v5  ;;  %v939_v5 = vld [vmem:[%s1689_s5 + $0x10] sm:$0xff] }
 0x51e   :  { %1296 = vmatpush3.msra.mxu1 %v939_v5 }
 0x51f   :  { %v907_v28 = vsel %vm57_vm1, %v906_v27, 0.0  ;;  %1297 = vmatprep.subr.mxu1 %v1392_v1 }
 0x520   :  { %908 = vadd.xlane.f32.xlu0 %v907_v28  ;;  %1298 = vmatpush3.msra.mxu1 %v938_v35 }
 0x521   :  { %1299 = vmatprep.subr.mxu1 %v1392_v1 }
 0x522   :  { %1300 = vmatpush3.msra.mxu1 %v937_v36 }
 0x5a9   :  { %v909_v29 = vpop.xlane.xlu0 %908 }
 0x5aa   :  { %v911_v30 = vmul.f32 0.03125, %v909_v29 }
 0x5ac   :  { %v912_v31 = vsub.f32 %v906_v27, %v911_v30 }
 0x5ae   :  { %v913_v32 = vmul.f32 %v912_v31, %v912_v31 }
 0x5b0   :  { %v914_v33 = vsel %vm57_vm1, %v913_v32, 0.0 }
 0x5b1   :  { %915 = vadd.xlane.f32.xlu1 %v914_v33 }
 0x63a   :  { %v916_v50 = vpop.xlane.xlu1 %915 }
 0x63b   :  { %v917_v51 = vmul.f32 0.03125, %v916_v50 }
 0x63d   :  { %v918_v52 = vadd.f32 1e-05, %v917_v51 }
 0x63f   :  { %1366 = vrsqrt.f32 %v918_v52 }
 0x64c   :  { %v1367_v53 = vpop.eup %1366 }
 0x64d   :  { %v920_v55 = vmul.f32 %v1367_v53, %v912_v31 }
 0x64f   :  { %v928_v57 = vmul.f32 %v1176_v54, %v920_v55 }
 0x651   :  { %v936_v58 = vadd.f32 %v1177_v56, %v928_v57 }
 0x653   :  { %1302 = vmatmul.mubr.msk.f32.vlgmr.msra.gmra.mxu1 %vm57_vm1, %v936_v58 }
 0x713   :  { %v1017_v63 = vpop.f32.mrf.mxu1 }
 0x714   :  { %v1018_v0 = vadd.f32 %v1178_v62, %v1017_v63 }
 0x715   :  { %v1303_v2 = vpop.f32.mrf.mxu1 }
 0x716   :  { %v1021_v3 = vmax.f32 %v1018_v0, 0.0 }
 0x718   :  { %1337 = vmatmul.mubr.f32.vlgmr.msra.gmra.mxu0 %v1021_v3 }
 0x7d8   :  { %v1111_v6 = vpop.f32.mrf.mxu0 }
 0x7d9   :  { %v1112_v1 = vadd.f32 %v1180_v4, %v1111_v6 }
 0x7da   :  { %v1338_v7 = vpop.f32.mrf.mxu0 }
 0x7db   :  { %v1115_v8 = vadd.f32 %v1112_v1, %v936_v58 }
 0x7dd   :  { %v1116_v9 = vsel %vm57_vm1, %v1115_v8, 0.0 }
 0x7de   :  { %1117 = vadd.xlane.f32.xlu0 %v1116_v9 }
 0x867   :  { %v1118_v10 = vpop.xlane.xlu0 %1117 }
 0x868   :  { %v1119_v11 = vmul.f32 0.03125, %v1118_v10 }
 0x86a   :  { %v1120_v12 = vsub.f32 %v1115_v8, %v1119_v11 }
 0x86c   :  { %v1121_v13 = vmul.f32 %v1120_v12, %v1120_v12 }
 0x86e   :  { %v1122_v14 = vsel %vm57_vm1, %v1121_v13, 0.0 }
 0x86f   :  { %1123 = vadd.xlane.f32.xlu0 %v1122_v14 }
 0x8f8   :  { %v1124_v15 = vpop.xlane.xlu0 %1123 }
 0x8f9   :  { %v1125_v16 = vmul.f32 0.03125, %v1124_v15 }
 0x8fb   :  { %v1126_v17 = vadd.f32 1e-05, %v1125_v16 }
 0x8fd   :  { %1368 = vrsqrt.f32 %v1126_v17 }
 0x90a   :  { %v1369_v18 = vpop.eup %1368 }
 0x90b   :  { %v1128_v20 = vmul.f32 %v1369_v18, %v1120_v12 }
 0x90d   :  { %v1136_v22 = vmul.f32 %v1181_v19, %v1128_v20 }
 0x90f   :  { %v1144_v23 = vadd.f32 %v1182_v21, %v1136_v22 }
 0x911   :  { %1145 = vst.msk [vmem:[#allocation3] sm:$0xff] %vm57_vm1, %v1144_v23 }
 0x912   :  { %1381 = shalt.err (!%p1378_p4)
}
 0x913   :  { %1155 = dma.vmem_to_hbm [thread:$0]  %s1153_s4, 128, %s1697_s13, [#allocation4]  }
 0x914   :  { %1390 = dma.done.wait [#allocation4], 128  }
 0x915   :  { %1391 = vsyncadd [#allocation4], 4294967168 }
 0x916   :  { %1159 = vsyncpa [#allocation4], 1 }

</bundles_post_ra>
